<compile_context>
chip_gen: v5e
topology: v5e:2x2
jax: 0.10.0
libtpu: 0.0.40
codegen_flags: <defaults>
</compile_context>

<pallas_src>
import jax
import jax.numpy as jnp
from jax.experimental import pallas as pl
from jax.experimental.pallas import tpu as pltpu


# ---------------------------------------------------------------------------
# Kernel
# ---------------------------------------------------------------------------
def _context_norm_kernel(a_ref, b_ref, c_ref, d_ref, mean_ref, sd_ref,
                         scale_ref, shift_ref,
                         oa_ref, ob_ref, oc_ref, od_ref):
    # Shared per-tile factors, computed once per grid step (VPU elementwise;
    # fully hidden under the HBM streaming on every TPU generation).
    mean = mean_ref[...]                         # (TB, D)
    g = scale_ref[...] / sd_ref[...]             # (TB, D): scale / sd
    h = shift_ref[...] - mean * g                # (TB, D): shift - mean*scale/sd

    # Each output: one mul + one add per element.
    oa_ref[...] = a_ref[...] * g + h
    ob_ref[...] = b_ref[...] * g + h
    oc_ref[...] = c_ref[...] * g + h
    od_ref[...] = d_ref[...] * g + h


# ---------------------------------------------------------------------------
# Tile-size selection
# ---------------------------------------------------------------------------
def _round_up(x, m):
    return ((x + m - 1) // m) * m


def _round_down(x, m):
    return (x // m) * m


def _pick_batch_tile(batch, latent_dim, block_batch, vmem_budget_bytes):
    """Pick the batch tile TB for (TB, latent_dim) blocks.

    10 f32 streams (A,B,C,D,mean,sd inputs + 4 outputs), each double-buffered
    by the Pallas pipeline -> bytes_per_row = 10 * 2 * D * 4.
    """
    n_streams = 10
    bytes_per_row = n_streams * 2 * latent_dim * 4
    tb_vmem = max(8, _round_down(vmem_budget_bytes // bytes_per_row, 8))
    tb = min(block_batch, tb_vmem)

    if batch <= tb:
        # Single block covering the full batch (block == full dim is legal
        # regardless of the (8,128) constraint).
        return batch

    # Guarantee >= 4 grid steps so the batch axis can be sharded across v7x's
    # two TensorCores and the double-buffer pipeline has a steady state.
    min_steps = 4
    tb = min(tb, max(8, _round_up(pl.cdiv(batch, min_steps), 8)))

    # Rebalance so the ragged tail block isn't nearly empty (it would still
    # pay the full ~0.35us per-step overhead and a masked writeback).
    steps = pl.cdiv(batch, tb)
    tb = max(8, _round_up(pl.cdiv(batch, steps), 8))
    return tb


# ---------------------------------------------------------------------------
# Wrapper
# ---------------------------------------------------------------------------
def context_norm_forward(A_latent, B_latent, C_latent, D_latent,
                         ABCD_mean, ABCD_SD, scale, shift,
                         *, block_batch=2048, vmem_budget_bytes=24 * 1024 * 1024):
    """Pallas implementation of Context_norm_model.forward.

    A/B/C/D_latent, ABCD_mean, ABCD_SD: (batch, latent_dim) float32
    scale, shift: (latent_dim,) float32
    Returns 4 tensors of shape (batch, latent_dim).
    """
    batch, latent_dim = A_latent.shape

    # scale/shift as (1, latent_dim) rows (== torch unsqueeze(0)).
    scale2d = scale.reshape(1, latent_dim)
    shift2d = shift.reshape(1, latent_dim)

    tb = _pick_batch_tile(batch, latent_dim, block_batch, vmem_budget_bytes)
    grid = (pl.cdiv(batch, tb),)

    tile = pl.BlockSpec((tb, latent_dim), lambda i: (i, 0))
    row = pl.BlockSpec((1, latent_dim), lambda i: (0, 0))

    out_shape = tuple(
        jax.ShapeDtypeStruct((batch, latent_dim), A_latent.dtype) for _ in range(4)
    )
    # TODO(synk): outputs could be emitted as bfloat16 (~20% less HBM traffic)
    # if the downstream consumer tolerates it; kept f32 to match the module.

    return pl.pallas_call(
        _context_norm_kernel,
        out_shape=out_shape,
        grid=grid,
        in_specs=[tile, tile, tile, tile, tile, tile, row, row],
        out_specs=(tile, tile, tile, tile),
        compiler_params=pltpu.CompilerParams(
            dimension_semantics=("parallel",),
            vmem_limit_bytes=32 * 1024 * 1024,
        ),
    )(A_latent, B_latent, C_latent, D_latent, ABCD_mean, ABCD_SD,
      scale2d, shift2d)


# ---------------------------------------------------------------------------
# Pure-JAX reference
# ---------------------------------------------------------------------------
def context_norm_reference(A, B, C, D, mean, sd, scale, shift):
    s = scale[None, :]
    t = shift[None, :]
    return tuple((x - mean) / sd * s + t for x in (A, B, C, D))


def _make_inputs(key, batch, latent_dim):
    kA, kB, kC, kD = jax.random.split(key, 4)
    A = jax.random.normal(kA, (batch, latent_dim), dtype=jnp.float32)
    B = jax.random.normal(kB, (batch, latent_dim), dtype=jnp.float32)
    C = jax.random.normal(kC, (batch, latent_dim), dtype=jnp.float32)
    D = jax.random.normal(kD, (batch, latent_dim), dtype=jnp.float32)
    # Context statistics over the A,B,C,D set (per sample, per latent dim),
    # as the surrounding training code computes and passes in.
    stacked = jnp.stack([A, B, C, D], axis=0)
    ABCD_mean = jnp.mean(stacked, axis=0)
    ABCD_SD = jnp.std(stacked, axis=0) + 1e-5
    return A, B, C, D, ABCD_mean, ABCD_SD


def _check(outs, refs):
    for o, r in zip(outs, refs):
        assert o.shape == r.shape
        assert jnp.allclose(o, r, atol=1e-5, rtol=1e-5), "mismatch vs reference"


if __name__ == "__main__":
    latent_dim = 128
    # Deterministic parameter init matching nn.init.ones_/zeros_ in __init__.
    scale = jnp.ones((latent_dim,), dtype=jnp.float32)
    shift = jnp.zeros((latent_dim,), dtype=jnp.float32)

    key = jax.random.PRNGKey(0)
    k1, k2 = jax.random.split(key)

    # Test 1: small batch -> single full-batch block.
    A, B, C, D, mean, sd = _make_inputs(k1, batch=8, latent_dim=latent_dim)
    outs = context_norm_forward(A, B, C, D, mean, sd, scale, shift)
    outs = jax.block_until_ready(outs)
    _check(outs, context_norm_reference(A, B, C, D, mean, sd, scale, shift))

    # Test 2: multi-tile grid with a ragged tail block (1030 % 64 != 0),
    # exercising tail masking and the tile-balancing path.
    A, B, C, D, mean, sd = _make_inputs(k2, batch=1030, latent_dim=latent_dim)
    outs = context_norm_forward(A, B, C, D, mean, sd, scale, shift,
                                block_batch=64)
    outs = jax.block_until_ready(outs)
    _check(outs, context_norm_reference(A, B, C, D, mean, sd, scale, shift))

    print("KERNEL_OK")
</pallas_src>

<mosaic_0001>
module attributes {stable_mosaic.version = 11 : i64} {
  func.func @_context_norm_kernel(%arg0: i32, %arg1: memref<8x128xf32, #tpu.memory_space<vmem>>, %arg2: memref<8x128xf32, #tpu.memory_space<vmem>>, %arg3: memref<8x128xf32, #tpu.memory_space<vmem>>, %arg4: memref<8x128xf32, #tpu.memory_space<vmem>>, %arg5: memref<8x128xf32, #tpu.memory_space<vmem>>, %arg6: memref<8x128xf32, #tpu.memory_space<vmem>>, %arg7: memref<1x128xf32, #tpu.memory_space<vmem>>, %arg8: memref<1x128xf32, #tpu.memory_space<vmem>>, %arg9: memref<8x128xf32, #tpu.memory_space<vmem>>, %arg10: memref<8x128xf32, #tpu.memory_space<vmem>>, %arg11: memref<8x128xf32, #tpu.memory_space<vmem>>, %arg12: memref<8x128xf32, #tpu.memory_space<vmem>>) attributes {dimension_semantics = [#tpu.dimension_semantics<parallel>], iteration_bounds = array<i64: 1>, scalar_prefetch = 0 : i64, scratch_operands = 0 : i64, tpu.core_type = #tpu.core_type<tc>, window_params = [{transform_indices = @transform_0, window_bounds = array<i64: 8, 128>}, {transform_indices = @transform_1, window_bounds = array<i64: 8, 128>}, {transform_indices = @transform_2, window_bounds = array<i64: 8, 128>}, {transform_indices = @transform_3, window_bounds = array<i64: 8, 128>}, {transform_indices = @transform_4, window_bounds = array<i64: 8, 128>}, {transform_indices = @transform_5, window_bounds = array<i64: 8, 128>}, {pipeline_mode = #tpu.pipeline_mode<synchronous>, transform_indices = @transform_6, window_bounds = array<i64: 1, 128>}, {pipeline_mode = #tpu.pipeline_mode<synchronous>, transform_indices = @transform_7, window_bounds = array<i64: 1, 128>}, {transform_indices = @transform_8, window_bounds = array<i64: 8, 128>}, {transform_indices = @transform_9, window_bounds = array<i64: 8, 128>}, {transform_indices = @transform_10, window_bounds = array<i64: 8, 128>}, {transform_indices = @transform_11, window_bounds = array<i64: 8, 128>}]} {
    %c0 = arith.constant 0 : index
    %c0_0 = arith.constant 0 : index
    %0 = vector.load %arg5[%c0, %c0_0] : memref<8x128xf32, #tpu.memory_space<vmem>>, vector<8x128xf32>
    %c0_1 = arith.constant 0 : index
    %c0_2 = arith.constant 0 : index
    %1 = vector.load %arg7[%c0_1, %c0_2] : memref<1x128xf32, #tpu.memory_space<vmem>>, vector<1x128xf32>
    %c0_3 = arith.constant 0 : index
    %c0_4 = arith.constant 0 : index
    %2 = vector.load %arg6[%c0_3, %c0_4] : memref<8x128xf32, #tpu.memory_space<vmem>>, vector<8x128xf32>
    %3 = vector.broadcast %1 : vector<1x128xf32> to vector<8x128xf32>
    %4 = arith.divf %3, %2 : vector<8x128xf32>
    %c0_5 = arith.constant 0 : index
    %c0_6 = arith.constant 0 : index
    %5 = vector.load %arg8[%c0_5, %c0_6] : memref<1x128xf32, #tpu.memory_space<vmem>>, vector<1x128xf32>
    %6 = arith.mulf %0, %4 : vector<8x128xf32>
    %7 = vector.broadcast %5 : vector<1x128xf32> to vector<8x128xf32>
    %8 = arith.subf %7, %6 : vector<8x128xf32>
    %c0_7 = arith.constant 0 : index
    %c0_8 = arith.constant 0 : index
    %9 = vector.load %arg1[%c0_7, %c0_8] : memref<8x128xf32, #tpu.memory_space<vmem>>, vector<8x128xf32>
    %10 = arith.mulf %9, %4 : vector<8x128xf32>
    %11 = arith.addf %10, %8 : vector<8x128xf32>
    %c0_9 = arith.constant 0 : index
    %c0_10 = arith.constant 0 : index
    %12 = vector.load %arg9[%c0_9, %c0_10] : memref<8x128xf32, #tpu.memory_space<vmem>>, vector<8x128xf32>
    tpu.vector_store %arg9[%c0_9, %c0_10], %11 {strides = array<i32>} : memref<8x128xf32, #tpu.memory_space<vmem>>, vector<8x128xf32>,
    %c0_11 = arith.constant 0 : index
    %c0_12 = arith.constant 0 : index
    %13 = vector.load %arg2[%c0_11, %c0_12] : memref<8x128xf32, #tpu.memory_space<vmem>>, vector<8x128xf32>
    %14 = arith.mulf %13, %4 : vector<8x128xf32>
    %15 = arith.addf %14, %8 : vector<8x128xf32>
    %c0_13 = arith.constant 0 : index
    %c0_14 = arith.constant 0 : index
    %16 = vector.load %arg10[%c0_13, %c0_14] : memref<8x128xf32, #tpu.memory_space<vmem>>, vector<8x128xf32>
    tpu.vector_store %arg10[%c0_13, %c0_14], %15 {strides = array<i32>} : memref<8x128xf32, #tpu.memory_space<vmem>>, vector<8x128xf32>,
    %c0_15 = arith.constant 0 : index
    %c0_16 = arith.constant 0 : index
    %17 = vector.load %arg3[%c0_15, %c0_16] : memref<8x128xf32, #tpu.memory_space<vmem>>, vector<8x128xf32>
    %18 = arith.mulf %17, %4 : vector<8x128xf32>
    %19 = arith.addf %18, %8 : vector<8x128xf32>
    %c0_17 = arith.constant 0 : index
    %c0_18 = arith.constant 0 : index
    %20 = vector.load %arg11[%c0_17, %c0_18] : memref<8x128xf32, #tpu.memory_space<vmem>>, vector<8x128xf32>
    tpu.vector_store %arg11[%c0_17, %c0_18], %19 {strides = array<i32>} : memref<8x128xf32, #tpu.memory_space<vmem>>, vector<8x128xf32>,
    %c0_19 = arith.constant 0 : index
    %c0_20 = arith.constant 0 : index
    %21 = vector.load %arg4[%c0_19, %c0_20] : memref<8x128xf32, #tpu.memory_space<vmem>>, vector<8x128xf32>
    %22 = arith.mulf %21, %4 : vector<8x128xf32>
    %23 = arith.addf %22, %8 : vector<8x128xf32>
    %c0_21 = arith.constant 0 : index
    %c0_22 = arith.constant 0 : index
    %24 = vector.load %arg12[%c0_21, %c0_22] : memref<8x128xf32, #tpu.memory_space<vmem>>, vector<8x128xf32>
    tpu.vector_store %arg12[%c0_21, %c0_22], %23 {strides = array<i32>} : memref<8x128xf32, #tpu.memory_space<vmem>>, vector<8x128xf32>,
    return
  }
  func.func @transform_0(%arg0: i32) -> (i32, i32) {
    %c0_i32 = arith.constant 0 : i32
    %c0_i32_0 = arith.constant 0 : i32
    return %arg0, %c0_i32 : i32, i32
  }
  func.func @transform_1(%arg0: i32) -> (i32, i32) {
    %c0_i32 = arith.constant 0 : i32
    %c0_i32_0 = arith.constant 0 : i32
    return %arg0, %c0_i32 : i32, i32
  }
  func.func @transform_2(%arg0: i32) -> (i32, i32) {
    %c0_i32 = arith.constant 0 : i32
    %c0_i32_0 = arith.constant 0 : i32
    return %arg0, %c0_i32 : i32, i32
  }
  func.func @transform_3(%arg0: i32) -> (i32, i32) {
    %c0_i32 = arith.constant 0 : i32
    %c0_i32_0 = arith.constant 0 : i32
    return %arg0, %c0_i32 : i32, i32
  }
  func.func @transform_4(%arg0: i32) -> (i32, i32) {
    %c0_i32 = arith.constant 0 : i32
    %c0_i32_0 = arith.constant 0 : i32
    return %arg0, %c0_i32 : i32, i32
  }
  func.func @transform_5(%arg0: i32) -> (i32, i32) {
    %c0_i32 = arith.constant 0 : i32
    %c0_i32_0 = arith.constant 0 : i32
    return %arg0, %c0_i32 : i32, i32
  }
  func.func @transform_6(%arg0: i32) -> (i32, i32) {
    %c0_i32 = arith.constant 0 : i32
    %c0_i32_0 = arith.constant 0 : i32
    %c0_i32_1 = arith.constant 0 : i32
    return %c0_i32, %c0_i32_0 : i32, i32
  }
  func.func @transform_7(%arg0: i32) -> (i32, i32) {
    %c0_i32 = arith.constant 0 : i32
    %c0_i32_0 = arith.constant 0 : i32
    %c0_i32_1 = arith.constant 0 : i32
    return %c0_i32, %c0_i32_0 : i32, i32
  }
  func.func @transform_8(%arg0: i32) -> (i32, i32) {
    %c0_i32 = arith.constant 0 : i32
    %c0_i32_0 = arith.constant 0 : i32
    return %arg0, %c0_i32 : i32, i32
  }
  func.func @transform_9(%arg0: i32) -> (i32, i32) {
    %c0_i32 = arith.constant 0 : i32
    %c0_i32_0 = arith.constant 0 : i32
    return %arg0, %c0_i32 : i32, i32
  }
  func.func @transform_10(%arg0: i32) -> (i32, i32) {
    %c0_i32 = arith.constant 0 : i32
    %c0_i32_0 = arith.constant 0 : i32
    return %arg0, %c0_i32 : i32, i32
  }
  func.func @transform_11(%arg0: i32) -> (i32, i32) {
    %c0_i32 = arith.constant 0 : i32
    %c0_i32_0 = arith.constant 0 : i32
    return %arg0, %c0_i32 : i32, i32
  }
}

</mosaic_0001>

<bundles_post_ra>
// kernel: tpu_custom_call.1
= control target key start
LH: loop header
LB: loop body
LE: loop exit
PB: predicated region body
PF: predicated region fallthrough
CT: control target
= control target key end

     0   :  { %17 = vsyncpa [#allocation3], 0  ;;  %s608_s0 = inlined_call_operand.hbm [shape: f32[8,128], index: 0, kind: input, shape index: {}]   ;;  %s609_s1 = inlined_call_operand.hbm [shape: f32[8,128], index: 1, kind: input, shape index: {}]   ;;  %s610_s2 = inlined_call_operand.hbm [shape: f32[8,128], index: 2, kind: input, shape index: {}]   ;;  %s611_s3 = inlined_call_operand.hbm [shape: f32[8,128], index: 3, kind: input, shape index: {}]   ;;  %s612_s4 = inlined_call_operand.hbm [shape: f32[8,128], index: 4, kind: input, shape index: {}]   ;;  %s613_s5 = inlined_call_operand.hbm [shape: f32[8,128], index: 5, kind: input, shape index: {}]   ;;  %s614_s6 = inlined_call_operand.vmem [shape: f32[1,128], index: 6, kind: input, shape index: {}]   ;;  %s615_s7 = inlined_call_operand.vmem [shape: f32[1,128], index: 7, kind: input, shape index: {}]   ;;  %s616_s8 = inlined_call_operand.hbm [shape: f32[8,128], index: 8, kind: output, shape index: {0}]   ;;  %s617_s9 = inlined_call_operand.hbm [shape: f32[8,128], index: 9, kind: output, shape index: {1}]   ;;  %s618_s10 = inlined_call_operand.hbm [shape: f32[8,128], index: 10, kind: output, shape index: {2}]   ;;  %s619_s11 = inlined_call_operand.hbm [shape: f32[8,128], index: 11, kind: output, shape index: {3}]  }
   0x1   :  { %18 = vsyncpa [#allocation6], 0 }
   0x2   :  { %19 = vsyncpa [#allocation9], 0 }
   0x3   :  { %20 = vsyncpa [#allocation12], 0 }
   0x4   :  { %21 = vsyncpa [#allocation4], 0 }
   0x5   :  { %22 = vsyncpa [#allocation15], 0  ;;  %s40_s19 = sshll.u32 %s609_s1, 4  ;;  %s41_s19 = int_to_ptr.hbm [resolvable:$true] %s40_s19 }
   0x6   :  { %23 = vsyncpa [#allocation18], 0  ;;  %s496_s20 = smov [#allocation5]   ;;  %s62_s24 = sshll.u32 %s611_s3, 4  ;;  %s63_s24 = int_to_ptr.hbm [resolvable:$true] %s62_s24 }
   0x7   :  { %s42_s21 = sshll.u32 %s496_s20, 4  ;;  %s497_s25 = smov [#allocation8]   ;;  %s43_s21 = int_to_ptr.vmem [resolvable:$true] %s42_s21 }
   0x8   :  { %45 = dma.hbm_to_vmem [thread:$0]  %s41_s19, 128, %s43_s21, [#allocation6]  }
   0x9   :  { %s64_s26 = sshll.u32 %s497_s25, 4  ;;  %s29_s29 = sshll.u32 %s608_s0, 4  ;;  %s65_s26 = int_to_ptr.vmem [resolvable:$true] %s64_s26  ;;  %s30_s29 = int_to_ptr.hbm [resolvable:$true] %s29_s29 }
   0xa   :  { %67 = dma.hbm_to_vmem [thread:$0]  %s63_s24, 128, %s65_s26, [#allocation9]  }
   0xb   :  { %s51_s12 = sshll.u32 %s610_s2, 4  ;;  %s498_s13 = smov [#allocation2]   ;;  %s52_s12 = int_to_ptr.hbm [resolvable:$true] %s51_s12 }
   0xc   :  { %s31_s14 = sshll.u32 %s498_s13, 4  ;;  %s499_s3 = smov [#allocation7]   ;;  %s32_s14 = int_to_ptr.vmem [resolvable:$true] %s31_s14 }
   0xd   :  { %34 = dma.hbm_to_vmem [thread:$0]  %s30_s29, 128, %s32_s14, [#allocation3]  }
   0xe   :  { %s53_s15 = sshll.u32 %s499_s3, 4  ;;  %s73_s18 = sshll.u32 %s612_s4, 4  ;;  %s54_s15 = int_to_ptr.vmem [resolvable:$true] %s53_s15  ;;  %s74_s18 = int_to_ptr.hbm [resolvable:$true] %s73_s18 }
   0xf   :  { %56 = dma.hbm_to_vmem [thread:$0]  %s52_s12, 128, %s54_s15, [#allocation6]  }
  0x10   :  { %s84_s20 = sshll.u32 %s613_s5, 4  ;;  %s500_s21 = smov [#allocation10]   ;;  %s85_s20 = int_to_ptr.hbm [resolvable:$true] %s84_s20 }
  0x11   :  { %s75_s2 = sshll.u32 %s500_s21, 4  ;;  %s501_s22 = smov [#allocation11]   ;;  %s76_s2 = int_to_ptr.vmem [resolvable:$true] %s75_s2 }
  0x12   :  { %78 = dma.hbm_to_vmem [thread:$0]  %s74_s18, 128, %s76_s2, [#allocation9]  }
  0x13   :  { %s86_s23 = sshll.u32 %s501_s22, 4  ;;  %s87_s23 = int_to_ptr.vmem [resolvable:$true] %s86_s23 }
  0x14   :  { %89 = dma.hbm_to_vmem [thread:$0]  %s85_s20, 128, %s87_s23, [#allocation12]  }
  0x15   :  { %482 = dma.done.wait [#allocation3], 128  }
  0x16   :  { %483 = vsyncadd [#allocation3], 4294967168 }
  0x17   :  { %484 = dma.done.wait [#allocation6], 256  }
  0x18   :  { %485 = vsyncadd [#allocation6], 4294967040 }
  0x19   :  { %486 = dma.done.wait [#allocation9], 256  }
  0x1a   :  { %487 = vsyncadd [#allocation9], 4294967040 }
  0x1b   :  { %488 = dma.done.wait [#allocation12], 128  }
  0x1c   :  { %489 = vsyncadd [#allocation12], 4294967168  ;;  %v120_v0 = vld [vmem:[#allocation11] sm:$0xff]  ;;  %v238_v8 = vld [vmem:[%s614_s6] ss:$0 sm:$0xff]  ;;  %s179_s26 = sshll.u32 %s617_s9, 4  ;;  %s595_s26 = int_to_ptr.hbm [resolvable:$true] %s179_s26 }
  0x1d   :  { %240 = vrcp.f32 %v120_v0  ;;  %v135_v3 = vand.u32 2147483648, %v120_v0  ;;  %vm129_vm0 = vweird.f32 %v120_v0  ;;  %v133_v5 = vand.u32 2147483647, %v120_v0  ;;  %v118_v10 = vld [vmem:[#allocation10] sm:$0xff]  ;;  %v149_v13 = vld [vmem:[#allocation5] sm:$0xff]  ;;  %v153_v15 = vld [vmem:[#allocation7] sm:$0xff] }
  0x1e   :  { %v145_v14 = vld [vmem:[#allocation2] sm:$0xff]  ;;  %s502_s27 = smov [#allocation14]   ;;  %v157_v18 = vld [vmem:[#allocation8] sm:$0xff]  ;;  %s503_s6 = smov [#allocation13]  }
  0x1f   :  { %v136_v7 = vor.u32 1.1754944e-38, %v135_v3  ;;  %vm134_vm3 = vcmp.eq.f32.partialorder %v133_v5, 8.507059e+37  ;;  %s590_s28 = sshll.u32 %s502_s27, 4  ;;  %v239_v17 = vld [vmem:[%s615_s7] ss:$0 sm:$0xff]  ;;  %s166_s9 = sshll.u32 %s503_s6, 4  ;;  %s178_s28 = int_to_ptr.vmem [resolvable:$true] %s590_s28  ;;  %s167_s9 = int_to_ptr.vmem [resolvable:$true] %s166_s9 }
  0x20   :  { %s168_s13 = sshll.u32 %s616_s8, 4  ;;  %s504_s14 = smov [#allocation16]   ;;  %s169_s13 = int_to_ptr.hbm [resolvable:$true] %s168_s13 }
  0x21   :  { %s188_s3 = sshll.u32 %s504_s14, 4  ;;  %s190_s16 = sshll.u32 %s618_s10, 4  ;;  %s189_s3 = int_to_ptr.vmem [resolvable:$true] %s188_s3  ;;  %s191_s16 = int_to_ptr.hbm [resolvable:$true] %s190_s16 }
  0x22   :  { %s505_s17 = smov [#allocation17]   ;;  %s201_s20 = sshll.u32 %s619_s11, 4  ;;  %s202_s20 = int_to_ptr.hbm [resolvable:$true] %s201_s20 }
  0x23   :  { %v241_v1 = vpop.eup %240  ;;  %s199_s18 = sshll.u32 %s505_s17, 4  ;;  %s200_s18 = int_to_ptr.vmem [resolvable:$true] %s199_s18 }
  0x24   :  { %v125_v2 = vmul.f32 %v241_v1, %v120_v0  ;;  %vm130_vm1 = vweird.f32 %v241_v1 }
  0x25   :  { %vm131_vm2 = vmor %vm129_vm0, %vm130_vm1 }
  0x26   :  { %v126_v4 = vsub.f32 1.0, %v125_v2 }
  0x28   :  { %v127_v6 = vmul.f32 %v241_v1, %v126_v4 }
  0x2a   :  { %v128_v9 = vadd.f32 %v241_v1, %v127_v6 }
  0x2c   :  { %v132_v11 = vsel %vm131_vm2, %v241_v1, %v128_v9 }
  0x2d   :  { %v137_v12 = vsel %vm134_vm3, %v136_v7, %v132_v11 }
  0x2e   :  { %v138_v16 = vmul.f32 %v238_v8, %v137_v12 }
  0x30   :  { %v140_v19 = vmul.f32 %v138_v16, %v118_v10  ;;  %v150_v20 = vmul.f32 %v149_v13, %v138_v16  ;;  %v146_v21 = vmul.f32 %v145_v14, %v138_v16  ;;  %v154_v22 = vmul.f32 %v153_v15, %v138_v16 }
  0x31   :  { %v158_v23 = vmul.f32 %v157_v18, %v138_v16 }
  0x32   :  { %v144_v24 = vsub.f32 %v239_v17, %v140_v19 }
  0x34   :  { %v151_v25 = vadd.f32 %v150_v20, %v144_v24  ;;  %v147_v26 = vadd.f32 %v146_v21, %v144_v24  ;;  %v155_v27 = vadd.f32 %v154_v22, %v144_v24  ;;  %v159_v28 = vadd.f32 %v158_v23, %v144_v24 }
  0x36   :  { %152 = vst [vmem:[#allocation14] sm:$0xff] %v151_v25 }
  0x37   :  { %148 = vst [vmem:[#allocation13] sm:$0xff] %v147_v26  ;;  %182 = dma.vmem_to_hbm [thread:$0]  %s178_s28, 128, %s595_s26, [#allocation15]  }
  0x38   :  { %156 = vst [vmem:[#allocation16] sm:$0xff] %v155_v27  ;;  %171 = dma.vmem_to_hbm [thread:$0]  %s167_s9, 128, %s169_s13, [#allocation4]  }
  0x39   :  { %160 = vst [vmem:[#allocation17] sm:$0xff] %v159_v28  ;;  %193 = dma.vmem_to_hbm [thread:$0]  %s189_s3, 128, %s191_s16, [#allocation15]  }
  0x3a   :  { %204 = dma.vmem_to_hbm [thread:$0]  %s200_s18, 128, %s202_s20, [#allocation18]  }
  0x3b   :  { %490 = dma.done.wait [#allocation4], 128  }
  0x3c   :  { %491 = vsyncadd [#allocation4], 4294967168 }
  0x3d   :  { %492 = dma.done.wait [#allocation15], 256  }
  0x3e   :  { %493 = vsyncadd [#allocation15], 4294967040 }
  0x3f   :  { %494 = dma.done.wait [#allocation18], 128  }
  0x40   :  { %495 = vsyncadd [#allocation18], 4294967168 }
  0x41   :  { %221 = vsyncpa [#allocation3], 1 }
  0x42   :  { %222 = vsyncpa [#allocation6], 1 }
  0x43   :  { %223 = vsyncpa [#allocation9], 1 }
  0x44   :  { %224 = vsyncpa [#allocation12], 1 }
  0x45   :  { %225 = vsyncpa [#allocation4], 1 }
  0x46   :  { %226 = vsyncpa [#allocation15], 1 }
  0x47   :  { %227 = vsyncpa [#allocation18], 1 }

</bundles_post_ra>
